<compile_context>
chip_gen: v7x
topology: tpu7x:2x2x1
jax: 0.10.0
libtpu: 0.0.40
codegen_flags: <defaults>
</compile_context>

<pallas_src>
import functools

import jax
import jax.numpy as jnp
from jax.experimental import pallas as pl
from jax.experimental.pallas import tpu as pltpu

INPUT_SIZE = 6
HIDDEN_SIZE = 4000
OUTPUT_SIZE = 10

IN_AUG = 8        # 6 inputs + 1 ones column (picks up W1's bias row) + 1 zero column
H_PAD = 4096      # 4000 padded to a multiple of 128; slot 4000 = constant-1 unit (b2 fold)
OUT_PAD = 128     # 10 padded to 128 (lane-dense output block, unmasked stores)
H_CHUNK = 1024    # W2 streaming chunk width in the latency regime


def _round_up(x, m):
    return -(-x // m) * m


def _tpu_tile_policy():
    """(max_batch_tile, tensorcores_per_chip) from the local device kind."""
    max_tb, cores = 256, 1
    try:
        kind = jax.devices()[0].device_kind.lower()
    except Exception:  # defensive: defaults are always safe, only perf-relevant
        kind = ""
    if "v5 lite" in kind or "v5lite" in kind or "v5e" in kind:
        max_tb, cores = 128, 1          # v5e MXU is 128-native
    elif "v6" in kind:
        max_tb, cores = 256, 1          # fill the 256-wide MXU
    elif "7" in kind:
        max_tb, cores = 256, 2          # 2 TensorCores per chip
    return max_tb, cores


def mlp_kernel(x_ref, w1_ref, w2_ref, o_ref, acc_ref, *, use_mxu_l1):
    """One (batch-tile, H-chunk) step: acc += relu(x @ W1_chunk) @ W2_chunk."""
    c = pl.program_id(1)

    @pl.when(c == 0)
    def _init():
        acc_ref[...] = jnp.zeros_like(acc_ref)

    if use_mxu_l1:
        # Large batch tile: layer 1 on the MXU (bf16 x bf16 -> f32 accumulate).
        h = jnp.dot(
            x_ref[...].astype(jnp.bfloat16),
            w1_ref[...].astype(jnp.bfloat16),
            preferred_element_type=jnp.float32,
        )
    else:
        # Tiny batch tile (latency regime): 7 broadcast-FMAs on the VPU, exact f32.
        tb = x_ref.shape[0]
        hc = w1_ref.shape[1]
        h = jnp.zeros((tb, hc), jnp.float32)
        for k in range(INPUT_SIZE + 1):          # 6 input cols + bias row (x[:, 6] == 1)
            h = h + x_ref[:, k:k + 1] * w1_ref[k:k + 1, :]

    h = jnp.maximum(h, 0.0).astype(jnp.bfloat16)             # ReLU; bf16 feed for the MXU
    acc_ref[...] += jnp.dot(h, w2_ref[...], preferred_element_type=jnp.float32)

    @pl.when(c == pl.num_programs(1) - 1)
    def _finalize():
        o_ref[...] = acc_ref[...].astype(o_ref.dtype)


def prepare_params(w1, b1, w2, b2):
    """One-time pack of PyTorch-style params into the padded kernel layout.

    w1: (INPUT_SIZE, HIDDEN_SIZE)   b1: (HIDDEN_SIZE,)
    w2: (HIDDEN_SIZE, OUTPUT_SIZE)  b2: (OUTPUT_SIZE,)
    """
    w1_aug = jnp.zeros((IN_AUG, H_PAD), jnp.float32)
    w1_aug = w1_aug.at[:INPUT_SIZE, :HIDDEN_SIZE].set(w1.astype(jnp.float32))
    w1_aug = w1_aug.at[INPUT_SIZE, :HIDDEN_SIZE].set(b1.astype(jnp.float32))   # b1 row
    # Constant-one hidden unit in padded slot HIDDEN_SIZE: relu(1 * 1) == 1, so the
    # matching W2 row carries b2 and no separate bias input / epilogue add is needed.
    w1_aug = w1_aug.at[INPUT_SIZE, HIDDEN_SIZE].set(1.0)

    w2_p = jnp.zeros((H_PAD, OUT_PAD), jnp.float32)
    w2_p = w2_p.at[:HIDDEN_SIZE, :OUTPUT_SIZE].set(w2.astype(jnp.float32))
    w2_p = w2_p.at[HIDDEN_SIZE, :OUTPUT_SIZE].set(b2.astype(jnp.float32))      # b2 fold
    w2_p = w2_p.astype(jnp.bfloat16)               # dominant HBM traffic -> bf16
    return w1_aug, w2_p


@jax.jit
def mlp_forward(x, w1_aug, w2_p):
    B = x.shape[0]
    max_tb, cores = _tpu_tile_policy()

    # Batch tile: one tile for small batches (no grid-step overhead); on 2-core
    # chips pick TB so the "parallel" batch axis has >= 2 steps; cap at the
    # MXU-friendly tile for the generation.
    if cores >= 2 and B > 8:
        TB = min(max_tb, _round_up(-(-B // cores), 8))
    elif B <= max_tb:
        TB = _round_up(B, 8)
    else:
        TB = max_tb
    B_pad = _round_up(B, TB)
    n_bt = B_pad // TB

    # Stream W2 over H chunks only when each core handles at most one batch tile
    # (hides its ~1 MiB DMA with no re-fetch penalty); otherwise keep W2 fully
    # resident so it is fetched once for all batch tiles.
    HC = H_CHUNK if n_bt <= cores else H_PAD
    n_hc = H_PAD // HC

    use_mxu_l1 = TB >= 128

    # Augmented input [x | 1 | 0]: the ones column picks up W1's bias row.
    x_aug = jnp.zeros((B_pad, IN_AUG), jnp.float32)
    x_aug = x_aug.at[:B, :INPUT_SIZE].set(x.astype(jnp.float32))
    x_aug = x_aug.at[:, INPUT_SIZE].set(1.0)

    out = pl.pallas_call(
        functools.partial(mlp_kernel, use_mxu_l1=use_mxu_l1),
        out_shape=jax.ShapeDtypeStruct((B_pad, OUT_PAD), jnp.float32),
        grid_spec=pltpu.PrefetchScalarGridSpec(
            num_scalar_prefetch=0,
            grid=(n_bt, n_hc),                                      # (batch, H-reduction)
            in_specs=[
                pl.BlockSpec((TB, IN_AUG), lambda i, c: (i, 0)),    # x tile (resident per i)
                pl.BlockSpec((IN_AUG, HC), lambda i, c: (0, c)),    # W1(+b1) chunk
                pl.BlockSpec((HC, OUT_PAD), lambda i, c: (c, 0)),   # W2(+b2) chunk (bf16)
            ],
            out_specs=pl.BlockSpec((TB, OUT_PAD), lambda i, c: (i, 0)),
            scratch_shapes=[pltpu.VMEM((TB, OUT_PAD), jnp.float32)],  # f32 accumulator
        ),
        compiler_params=pltpu.CompilerParams(
            dimension_semantics=("parallel", "arbitrary"),
        ),
    )(x_aug, w1_aug, w2_p)
    return out[:B, :OUTPUT_SIZE]


def init_params(key):
    """Deterministic init mimicking PyTorch nn.Linear default (uniform +-1/sqrt(fan_in))."""
    k1, k2, k3, k4 = jax.random.split(key, 4)
    bound1 = 1.0 / float(INPUT_SIZE ** 0.5)
    bound2 = 1.0 / float(HIDDEN_SIZE ** 0.5)
    # weights stored as (in, out) == transpose of PyTorch's (out, in)
    w1 = jax.random.uniform(k1, (INPUT_SIZE, HIDDEN_SIZE), jnp.float32, -bound1, bound1)
    b1 = jax.random.uniform(k2, (HIDDEN_SIZE,), jnp.float32, -bound1, bound1)
    w2 = jax.random.uniform(k3, (HIDDEN_SIZE, OUTPUT_SIZE), jnp.float32, -bound2, bound2)
    b2 = jax.random.uniform(k4, (OUTPUT_SIZE,), jnp.float32, -bound2, bound2)
    return w1, b1, w2, b2


if __name__ == "__main__":
    key = jax.random.PRNGKey(0)
    pkey, xkey_s, xkey_l = jax.random.split(key, 3)
    w1, b1, w2, b2 = init_params(pkey)
    w1_aug, w2_p = prepare_params(w1, b1, w2, b2)

    def reference(x):
        # Pure-JAX f32 reference (same math as the PyTorch module).
        return jnp.maximum(x @ w1 + b1, 0.0) @ w2 + b2

    # Latency regime: small batch -> single/tiny batch tiles, VPU layer 1, streamed W2.
    x_small = jax.random.normal(xkey_s, (16, INPUT_SIZE), jnp.float32)
    out_small = jax.block_until_ready(mlp_forward(x_small, w1_aug, w2_p))
    assert out_small.shape == (16, OUTPUT_SIZE)
    ref_small = reference(x_small)
    assert jnp.allclose(out_small, ref_small, atol=5e-2, rtol=5e-2), float(
        jnp.max(jnp.abs(out_small - ref_small)))

    # Throughput regime: larger batch -> bf16 MXU layer 1, big batch tiles.
    x_large = jax.random.normal(xkey_l, (256, INPUT_SIZE), jnp.float32)
    out_large = jax.block_until_ready(mlp_forward(x_large, w1_aug, w2_p))
    assert out_large.shape == (256, OUTPUT_SIZE)
    ref_large = reference(x_large)
    assert jnp.allclose(out_large, ref_large, atol=5e-2, rtol=5e-2), float(
        jnp.max(jnp.abs(out_large - ref_large)))

    print("KERNEL_OK")
</pallas_src>

<mosaic_0001>
module attributes {stable_mosaic.version = 11 : i64} {
  func.func @mlp_kernel(%arg0: i32, %arg1: i32, %arg2: memref<16x8xf32, #tpu.memory_space<vmem>>, %arg3: memref<8x1024xf32, #tpu.memory_space<vmem>>, %arg4: memref<1024x128xbf16, #tpu.memory_space<vmem>>, %arg5: memref<16x128xf32, #tpu.memory_space<vmem>>, %arg6: memref<16x128xf32, #tpu.memory_space<vmem>>) attributes {dimension_semantics = [#tpu.dimension_semantics<parallel>, #tpu.dimension_semantics<arbitrary>], iteration_bounds = array<i64: 1, 4>, scalar_prefetch = 0 : i64, scratch_operands = 1 : i64, tpu.core_type = #tpu.core_type<tc>, window_params = [{transform_indices = @transform_0, window_bounds = array<i64: 16, 8>}, {transform_indices = @transform_1, window_bounds = array<i64: 8, 1024>}, {transform_indices = @transform_2, window_bounds = array<i64: 1024, 128>}, {transform_indices = @transform_3, window_bounds = array<i64: 16, 128>}]} {
    %c0_i32 = arith.constant 0 : i32
    %0 = arith.cmpi eq, %arg1, %c0_i32 : i32
    %1 = arith.extui %0 : i1 to i32
    %c0_i32_0 = arith.constant 0 : i32
    %2 = arith.cmpi ne, %1, %c0_i32_0 : i32
    scf.if %2 {
      %cst_31 = arith.constant 0.000000e+00 : f32
      %57 = vector.broadcast %cst_31 : f32 to vector<16x128xf32>
      %c0_32 = arith.constant 0 : index
      %c0_33 = arith.constant 0 : index
      %58 = vector.load %arg6[%c0_32, %c0_33] : memref<16x128xf32, #tpu.memory_space<vmem>>, vector<16x128xf32>
      tpu.vector_store %arg6[%c0_32, %c0_33], %57 {strides = array<i32>} : memref<16x128xf32, #tpu.memory_space<vmem>>, vector<16x128xf32>,
    } else {
    }
    %cst = arith.constant 0.000000e+00 : f32
    %3 = vector.broadcast %cst : f32 to vector<16x1024xf32>
    %c0 = arith.constant 0 : index
    %c0_1 = arith.constant 0 : index
    %4 = vector.load %arg2[%c0, %c0_1] : memref<16x8xf32, #tpu.memory_space<vmem>>, vector<16x1xf32>
    %c0_2 = arith.constant 0 : index
    %c0_3 = arith.constant 0 : index
    %5 = vector.load %arg3[%c0_2, %c0_3] : memref<8x1024xf32, #tpu.memory_space<vmem>>, vector<1x1024xf32>
    %6 = vector.broadcast %4 : vector<16x1xf32> to vector<16x1024xf32>
    %7 = vector.broadcast %5 : vector<1x1024xf32> to vector<16x1024xf32>
    %8 = arith.mulf %6, %7 : vector<16x1024xf32>
    %9 = arith.addf %3, %8 : vector<16x1024xf32>
    %c0_4 = arith.constant 0 : index
    %c1 = arith.constant 1 : index
    %10 = vector.load %arg2[%c0_4, %c1] : memref<16x8xf32, #tpu.memory_space<vmem>>, vector<16x1xf32>
    %c1_5 = arith.constant 1 : index
    %c0_6 = arith.constant 0 : index
    %11 = vector.load %arg3[%c1_5, %c0_6] : memref<8x1024xf32, #tpu.memory_space<vmem>>, vector<1x1024xf32>
    %12 = vector.broadcast %10 : vector<16x1xf32> to vector<16x1024xf32>
    %13 = vector.broadcast %11 : vector<1x1024xf32> to vector<16x1024xf32>
    %14 = arith.mulf %12, %13 : vector<16x1024xf32>
    %15 = arith.addf %9, %14 : vector<16x1024xf32>
    %c0_7 = arith.constant 0 : index
    %c2 = arith.constant 2 : index
    %16 = vector.load %arg2[%c0_7, %c2] : memref<16x8xf32, #tpu.memory_space<vmem>>, vector<16x1xf32>
    %c2_8 = arith.constant 2 : index
    %c0_9 = arith.constant 0 : index
    %17 = vector.load %arg3[%c2_8, %c0_9] : memref<8x1024xf32, #tpu.memory_space<vmem>>, vector<1x1024xf32>
    %18 = vector.broadcast %16 : vector<16x1xf32> to vector<16x1024xf32>
    %19 = vector.broadcast %17 : vector<1x1024xf32> to vector<16x1024xf32>
    %20 = arith.mulf %18, %19 : vector<16x1024xf32>
    %21 = arith.addf %15, %20 : vector<16x1024xf32>
    %c0_10 = arith.constant 0 : index
    %c3 = arith.constant 3 : index
    %22 = vector.load %arg2[%c0_10, %c3] : memref<16x8xf32, #tpu.memory_space<vmem>>, vector<16x1xf32>
    %c3_11 = arith.constant 3 : index
    %c0_12 = arith.constant 0 : index
    %23 = vector.load %arg3[%c3_11, %c0_12] : memref<8x1024xf32, #tpu.memory_space<vmem>>, vector<1x1024xf32>
    %24 = vector.broadcast %22 : vector<16x1xf32> to vector<16x1024xf32>
    %25 = vector.broadcast %23 : vector<1x1024xf32> to vector<16x1024xf32>
    %26 = arith.mulf %24, %25 : vector<16x1024xf32>
    %27 = arith.addf %21, %26 : vector<16x1024xf32>
    %c0_13 = arith.constant 0 : index
    %c4 = arith.constant 4 : index
    %28 = vector.load %arg2[%c0_13, %c4] : memref<16x8xf32, #tpu.memory_space<vmem>>, vector<16x1xf32>
    %c4_14 = arith.constant 4 : index
    %c0_15 = arith.constant 0 : index
    %29 = vector.load %arg3[%c4_14, %c0_15] : memref<8x1024xf32, #tpu.memory_space<vmem>>, vector<1x1024xf32>
    %30 = vector.broadcast %28 : vector<16x1xf32> to vector<16x1024xf32>
    %31 = vector.broadcast %29 : vector<1x1024xf32> to vector<16x1024xf32>
    %32 = arith.mulf %30, %31 : vector<16x1024xf32>
    %33 = arith.addf %27, %32 : vector<16x1024xf32>
    %c0_16 = arith.constant 0 : index
    %c5 = arith.constant 5 : index
    %34 = vector.load %arg2[%c0_16, %c5] : memref<16x8xf32, #tpu.memory_space<vmem>>, vector<16x1xf32>
    %c5_17 = arith.constant 5 : index
    %c0_18 = arith.constant 0 : index
    %35 = vector.load %arg3[%c5_17, %c0_18] : memref<8x1024xf32, #tpu.memory_space<vmem>>, vector<1x1024xf32>
    %36 = vector.broadcast %34 : vector<16x1xf32> to vector<16x1024xf32>
    %37 = vector.broadcast %35 : vector<1x1024xf32> to vector<16x1024xf32>
    %38 = arith.mulf %36, %37 : vector<16x1024xf32>
    %39 = arith.addf %33, %38 : vector<16x1024xf32>
    %c0_19 = arith.constant 0 : index
    %c6 = arith.constant 6 : index
    %40 = vector.load %arg2[%c0_19, %c6] : memref<16x8xf32, #tpu.memory_space<vmem>>, vector<16x1xf32>
    %c6_20 = arith.constant 6 : index
    %c0_21 = arith.constant 0 : index
    %41 = vector.load %arg3[%c6_20, %c0_21] : memref<8x1024xf32, #tpu.memory_space<vmem>>, vector<1x1024xf32>
    %42 = vector.broadcast %40 : vector<16x1xf32> to vector<16x1024xf32>
    %43 = vector.broadcast %41 : vector<1x1024xf32> to vector<16x1024xf32>
    %44 = arith.mulf %42, %43 : vector<16x1024xf32>
    %45 = arith.addf %39, %44 : vector<16x1024xf32>
    %cst_22 = arith.constant 0.000000e+00 : f32
    %46 = vector.broadcast %cst_22 : f32 to vector<16x1024xf32>
    %47 = arith.maximumf %45, %46 : vector<16x1024xf32>
    %48 = arith.truncf %47 : vector<16x1024xf32> to vector<16x1024xbf16>
    %c0_23 = arith.constant 0 : index
    %c0_24 = arith.constant 0 : index
    %49 = vector.load %arg6[%c0_23, %c0_24] : memref<16x128xf32, #tpu.memory_space<vmem>>, vector<16x128xf32>
    %c0_25 = arith.constant 0 : index
    %c0_26 = arith.constant 0 : index
    %50 = vector.load %arg4[%c0_25, %c0_26] : memref<1024x128xbf16, #tpu.memory_space<vmem>>, vector<1024x128xbf16>
    %cst_27 = arith.constant dense<0.000000e+00> : vector<16x128xf32>
    %51 = tpu.matmul %48, %50, %cst_27 {dimension_numbers = #tpu.dot_dimension_numbers<[1], [0], [0], [1], [0, 0, 1, 1], [], []>} : vector<16x1024xbf16>, vector<1024x128xbf16>, vector<16x128xf32> -> vector<16x128xf32>
    %52 = arith.addf %49, %51 : vector<16x128xf32>
    %c0_28 = arith.constant 0 : index
    %c0_29 = arith.constant 0 : index
    %53 = vector.load %arg6[%c0_28, %c0_29] : memref<16x128xf32, #tpu.memory_space<vmem>>, vector<16x128xf32>
    tpu.vector_store %arg6[%c0_28, %c0_29], %52 {strides = array<i32>} : memref<16x128xf32, #tpu.memory_space<vmem>>, vector<16x128xf32>,
    %c3_i32 = arith.constant 3 : i32
    %54 = arith.cmpi eq, %arg1, %c3_i32 : i32
    %55 = arith.extui %54 : i1 to i32
    %c0_i32_30 = arith.constant 0 : i32
    %56 = arith.cmpi ne, %55, %c0_i32_30 : i32
    scf.if %56 {
      %c0_31 = arith.constant 0 : index
      %c0_32 = arith.constant 0 : index
      %57 = vector.load %arg6[%c0_31, %c0_32] : memref<16x128xf32, #tpu.memory_space<vmem>>, vector<16x128xf32>
      %c0_33 = arith.constant 0 : index
      %c0_34 = arith.constant 0 : index
      %58 = vector.load %arg5[%c0_33, %c0_34] : memref<16x128xf32, #tpu.memory_space<vmem>>, vector<16x128xf32>
      tpu.vector_store %arg5[%c0_33, %c0_34], %57 {strides = array<i32>} : memref<16x128xf32, #tpu.memory_space<vmem>>, vector<16x128xf32>,
    } else {
    }
    return
  }
  func.func @transform_0(%arg0: i32, %arg1: i32) -> (i32, i32) {
    %c0_i32 = arith.constant 0 : i32
    %c0_i32_0 = arith.constant 0 : i32
    return %arg0, %c0_i32 : i32, i32
  }
  func.func @transform_1(%arg0: i32, %arg1: i32) -> (i32, i32) {
    %c0_i32 = arith.constant 0 : i32
    %c0_i32_0 = arith.constant 0 : i32
    return %c0_i32, %arg1 : i32, i32
  }
  func.func @transform_2(%arg0: i32, %arg1: i32) -> (i32, i32) {
    %c0_i32 = arith.constant 0 : i32
    %c0_i32_0 = arith.constant 0 : i32
    return %arg1, %c0_i32 : i32, i32
  }
  func.func @transform_3(%arg0: i32, %arg1: i32) -> (i32, i32) {
    %c0_i32 = arith.constant 0 : i32
    %c0_i32_0 = arith.constant 0 : i32
    return %arg0, %c0_i32 : i32, i32
  }
}

</mosaic_0001>

<bundles_post_ra>
// kernel: mlp_forward.1
= control target key start
LH: loop header
LB: loop body
LE: loop exit
PB: predicated region body
PF: predicated region fallthrough
CT: control target
= control target key end

     0   :  { %8 = vsyncpa [#allocation4], 0  ;;  %s2912_s0 = inlined_call_operand.vmem [shape: f32[16,8], index: 0, kind: input, shape index: {}]   ;;  %s2913_s1 = inlined_call_operand.hbm [shape: f32[8,4096], index: 1, kind: input, shape index: {}]   ;;  %s2914_s2 = inlined_call_operand.hbm [shape: bf16[4096,128], index: 2, kind: input, shape index: {}]   ;;  %s2915_s3 = inlined_call_operand.hbm [shape: f32[16,128], index: 3, kind: output, shape index: {}]  }
   0x1   :  { %10 = vsyncpa [#allocation4 + $0x1], 0 }
   0x2   :  { %11 = vsyncpa [#allocation7], 0 }
   0x3   :  { %13 = vsyncpa [#allocation7 + $0x1], 0 }
   0x4   :  { %14 = vsyncpa [#allocation5], 0  ;;  %s2207_s12 = smov 0   ;;  %s2209_s13 = smov 0  }
   0x5   :  { %s2211_s14 = smov 0   ;;  %s2213_s15 = smov 0  }
   0x6   :  { %s2215_s16 = smov 0   ;;  %s2217_s17 = smov 0  }
   0x7 LB: > { %s1687_s18 = sadd.s32 4294967295, %s2170_s17   ;;  %s29_s19 = sadd.s32 1, %s2166_s16  ;;  %s2170_s17 = sphi %s2217_s17, %s20_s17   ;;  %s2166_s16 = sphi %s2215_s16, %s2991_s16   ;;  %s2162_s15 = sphi %s2213_s15, %s2990_s15   ;;  %s2158_s14 = sphi %s2211_s14, %s2989_s14   ;;  %s2154_s13 = sphi %s2209_s13, %s2988_s13   ;;  %s2150_s12 = sphi %s2207_s12, %s2987_s12  }
   0x8   : > { %p30_p0 = scmp.ge.s32.totalorder %s29_s19, 4  ;;  %s65_s20 = sadd.s32 1, %s2158_s14 }
   0x9   : > { %p72_p1 = scmp.ne.s32.totalorder %s2158_s14, %s2154_s13  ;;  %p73_p2 = scmp.eq.s32.totalorder %s2170_s17, 0 }
   0xa   : > { %s2993_s19 = smov (%p30_p0, %s29_s19), 0  ;;  %p78_p4 = scmp.ne.s32.totalorder %s2154_s13, %s2150_s12 }
   0xb   : > { %p2243_p3 = por %p73_p2, %p72_p1  ;;  %s62_s22 = ssub.s32 %s2166_s16, %s2993_s19 }
   0xc   : > { %p79_p5 = scmp.eq.s32.totalorder %s1687_s18, 0  ;;  %p63_p6 = scmp.eq.s32.totalorder %s62_s22, 0 }
   0xd   : > { %p1887_p8 = scmp.lt.s32.totalorder %s2170_s17, 4  ;;  %s2261_s25 = sand.u32 1, %s2158_s14  }
   0xe   : > { %p2252_p7 = por %p79_p5, %p78_p4  ;;  %s1782_s26 = sshll.u32 %s2166_s16, 10 }
   0xf   : > { %s2258_s24 = scalar_select %p63_p6, %s2158_s14, %s65_s20  }
  0x10   : > { %s2940_s23 = scalar_select %p2252_p7, 1, 0 }
  0x11   : > { %s1691_s27 = sshll.u32 %s2261_s25, 6  ;;  %s2268_s30 = scalar_lea.hbm %s2913_s1, %s1782_s26 }
  0x12   : > { %s167_s4 = scalar_lea.vmem [#allocation3], %s1691_s27  ;;  %p2272_p9 = pnand %p1887_p8, %p2243_p3 }
  0x13   : > { %s175_s5 = sshll.u32 %s167_s4, 4  ;;  %s164_s7 = scalar_lea.sflag [#allocation4], %s2261_s25  ;;  %s2276_s5 = int_to_ptr.vmem [resolvable:$true] %s175_s5 }
  0x14   : > { %s2026_s8 = scalar_lea.hbm %s2268_s30, 1024  ;;  %p2028_p13 = pneg %p2272_p9 }
  0x15   : > { %p2027_p12 = scmp.ne.s32.totalorder %s2268_s30, %s2026_s8  ;;  %s2031_s11 = scalar_lea.hbm %s2913_s1, 4096 }
  0x16   : > { %p2032_p2 = scmp.lt.u32.totalorder %s2268_s30, %s2913_s1  ;;  %p2033_p3 = scmp.lt.u32.totalorder %s2031_s11, %s2026_s8 }
  0x17   : > { %p2029_p0 = pnand %p2028_p13, %p2027_p12  ;;  %p2035_p5 = scmp.lt.u32.totalorder %s2026_s8, %s2268_s30 }
  0x18   : > { %p2034_p4 = por %p2033_p3, %p2032_p2 }
  0x19   : > { %p2030_p1 = pneg %p2029_p0 }
  0x1a   : > { %p2036_p6 = por %p2035_p5, %p2034_p4 }
  0x1c   : > { %p2037_p8 = pnand %p2036_p6, %p2030_p1 }
  0x1e   : > { %2040 = shalt.err (!%p2037_p8)
}
  0x1f   : > { %s2041_s21 = scalar_lea.vmem %s2276_s5, 1024  ;;  %s2172_s22 = smov [#allocation3]  }
  0x20   : > { %p2042_p12 = scmp.ne.s32.totalorder %s2276_s5, %s2041_s21  ;;  %s2046_s26 = sshll.u32 %s2172_s22, 4  ;;  %s2047_s26 = int_to_ptr.vmem [resolvable:$false] %s2046_s26 }
  0x21   : > { %s2048_s27 = scalar_lea.vmem %s2047_s26, 2048  ;;  %p2049_p11 = scmp.lt.s32.totalorder %s2276_s5, %s2047_s26 }
  0x22   : > { %p2044_p0 = pnand %p2042_p12, %p2028_p13  ;;  %p2050_p2 = scmp.lt.s32.totalorder %s2048_s27, %s2041_s21 }
  0x24   : > { %p2045_p10 = pneg %p2044_p0  ;;  %p2051_p3 = por %p2050_p2, %p2049_p11 }
  0x26   : > { %p2052_p4 = pnand %p2051_p3, %p2045_p10 }
  0x28   : > { %2055 = shalt.err (!%p2052_p4)
}
  0x29   : > { %1883 = dma.hbm_to_vmem [thread:$0]  (!%p2272_p9), %s2268_s30, 1024, %s2276_s5, %s164_s7  }
  0x2a   : > { %p2942_p1 = scmp.lt.s32.totalorder %s2170_s17, 5  ;;  %p2943_p5 = scmp.ge.s32.totalorder %s2170_s17, 1 }
  0x2b   : > { %s1694_s29 = sshll.u32 %s2261_s25, 9  ;;  %s1783_s4 = sshll.u32 %s2166_s16, 13 }
  0x2c   : > { %p2310_p6 = pnand %p2943_p5, %p2942_p1  ;;  %s2319_s10 = scalar_lea.hbm %s2914_s2, %s1783_s4 }
  0x2d   : > { %s186_s11 = scalar_lea.vmem [#allocation6], %s1694_s29  ;;  %s183_s30 = scalar_lea.sflag [#allocation7], %s2261_s25 }
  0x2e   : > { %s193_s12 = sshll.u32 %s186_s11, 4  ;;  %s2056_s5 = scalar_lea.hbm %s2319_s10, 8192  ;;  %s2321_s12 = int_to_ptr.vmem [resolvable:$true] %s193_s12 }
  0x2f   : > { %p2057_p10 = scmp.ne.s32.totalorder %s2319_s10, %s2056_s5  ;;  %s2061_s21 = scalar_lea.hbm %s2914_s2, 32768 }
  0x30   : > { %p2062_p12 = scmp.lt.u32.totalorder %s2319_s10, %s2914_s2  ;;  %p2063_p0 = scmp.lt.u32.totalorder %s2061_s21, %s2056_s5 }
  0x31   : > { %p2059_p11 = pnand %p2057_p10, %p2028_p13  ;;  %p2065_p3 = scmp.lt.u32.totalorder %s2056_s5, %s2319_s10 }
  0x32   : > { %p2064_p2 = por %p2063_p0, %p2062_p12 }
  0x33   : > { %p2060_p8 = pneg %p2059_p11 }
  0x34   : > { %p2066_p4 = por %p2065_p3, %p2064_p2 }
  0x36   : > { %p2067_p1 = pnand %p2066_p4, %p2060_p8 }
  0x38   : > { %2070 = shalt.err (!%p2067_p1)
}
  0x39   : > { %s2071_s27 = scalar_lea.vmem %s2321_s12, 8192  ;;  %s2173_s29 = smov [#allocation6]  }
  0x3a   : > { %p2072_p5 = scmp.ne.s32.totalorder %s2321_s12, %s2071_s27  ;;  %s2076_s4 = sshll.u32 %s2173_s29, 4  ;;  %s2077_s4 = int_to_ptr.vmem [resolvable:$false] %s2076_s4 }
  0x3b   : > { %s2078_s8 = scalar_lea.vmem %s2077_s4, 16384  ;;  %p2079_p7 = scmp.lt.s32.totalorder %s2321_s12, %s2077_s4 }
  0x3c   : > { %p2074_p10 = pnand %p2072_p5, %p2028_p13  ;;  %p2080_p12 = scmp.lt.s32.totalorder %s2078_s8, %s2071_s27 }
  0x3e   : > { %p2075_p11 = pneg %p2074_p10  ;;  %p2081_p0 = por %p2080_p12, %p2079_p7 }
  0x40   : > { %p2082_p2 = pnand %p2081_p0, %p2075_p11 }
  0x42   : > { %2085 = shalt.err (!%p2082_p2)
}
  0x43   : > { %s2174_s9 = smov 64   ;;  %s2175_s11 = smov 4  }
  0x44   : > { %1886 = dma.hbm_to_vmem [thread:$0]  (!%p2272_p9), %s2319_s10, 8192, %s2321_s12, %s183_s30, %s2174_s9, %s2174_s9, %s2175_s11  }
  0x45   : > { %205 = sbr.rel (%p2310_p6) target bundleno = 554 (0x22a), region = 32 }
  0x4c   : > { %s207_s5 = sand.u32 1, %s2154_s13   ;;  %p2945_p7 = scmp.ne.s32.totalorder %s2940_s23, 0 }
  0x4d   : > { %s1698_s7 = sshll.u32 %s207_s5, 6  ;;  %s208_s20 = scalar_lea.sflag [#allocation4], %s207_s5 }
  0x4e   : > { %s2352_s21 = scalar_lea.vmem [#allocation3], %s1698_s7 }
  0x4f   : > { %2137 = dma.done.wait (%p2945_p7), %s208_s20, 1024  }
  0x50   : > { %2139 = vsyncadd (%p2945_p7), %s208_s20, 4294966272  ;;  %s1699_s22 = sshll.u32 %s207_s5, 9  ;;  %s217_s6 = scalar_lea.sflag [#allocation7], %s207_s5 }
  0x51   : > { %s2358_s25 = scalar_lea.vmem [#allocation6], %s1699_s22 }
  0x52   : > { %2141 = dma.done.wait (%p2945_p7), %s217_s6, 8192  }
  0x53   : > { %2143 = vsyncadd (%p2945_p7), %s217_s6, 4294959104  ;;  %p1700_p9 = scmp.ne.s32.totalorder %s2162_s15, 0 }
  0x54   : > { %v2176_v0 = vmov (!%p1700_p9), 0.0  }
  0x55   : > { %261 = sbr.rel (%p1700_p9) target bundleno = 92 (0x5c), region = 44  ;;  %262 = vst [vmem:[#allocation2] sm:$0xff] (!%p1700_p9), %v2176_v0  ;;  %263 = vst [vmem:[#allocation2 + $0x8] sm:$0xff] (!%p1700_p9), %v2176_v0 }
  0x5c PF: > { %v2368_v1 = vld [vmem:[%s2912_s0] sm:$0xff]  ;;  %v2177_v2 = vmov 1   ;;  %v2178_v3 = vmov 0   ;;  %v2375_v4 = vld [vmem:[%s2912_s0 + $0x8] sm:$0xff]  ;;  %v1962_v5 = vld [vmem:[%s2358_s25 + $0x40] sm:$0xff]   ;;  %v2179_v7 = vmov 2   ;;  %v280_v44 = vlaneseq }
  0x5d   : > { %1952 = vset.pattern.permute.xlu1 %v2177_v2  ;;  %1951 = vset.pattern.permute.xlu0 %v2178_v3  ;;  %v1963_v6 = vld [vmem:[%s2358_s25 + $0xc0] sm:$0xff]   ;;  %v1966_v10 = vld [vmem:[%s2358_s25 + $0x48] sm:$0xff]   ;;  %v2180_v14 = vmov 3   ;;  %v1970_v15 = vld [vmem:[%s2358_s25 + $0x50] sm:$0xff]   ;;  %v2181_v19 = vmov 4   ;;  %v2182_v20 = vmov 5  }
  0x5e   : > { %357 = vperm.xlu1 %1952, %v2368_v1   ;;  %271 = vperm.xlu0 %1951, %v2368_v1   ;;  %v1964_v8 = vld [vmem:[%s2358_s25] sm:$0xff]   ;;  %v1967_v11 = vld [vmem:[%s2358_s25 + $0xc8] sm:$0xff]   ;;  %v1971_v16 = vld [vmem:[%s2358_s25 + $0xd0] sm:$0xff]   ;;  %v2183_v28 = vmov 6   ;;  %v281_v46 = vshrl.u32 %v280_v44, 7  ;;  %p1777_p13 = scmp.ne.s32.totalorder %s2162_s15, 3 }
  0x5f   : > { %v1965_v9 = vld [vmem:[%s2358_s25 + $0x80] sm:$0xff]   ;;  %1784 = vmatprep.subr.bf16.mxu0 %v1962_v5  ;;  %1806 = vmatprep.subr.bf16.mxu1 %v1963_v6  ;;  %v1968_v12 = vld [vmem:[%s2358_s25 + $0x8] sm:$0xff]   ;;  %v1972_v17 = vld [vmem:[%s2358_s25 + $0x10] sm:$0xff]  }
  0x60   : > { %1785 = vmatpush3.bf16.msra.mxu0 %v1964_v8  ;;  %1807 = vmatpush3.bf16.msra.mxu1 %v1965_v9  ;;  %v1969_v13 = vld [vmem:[%s2358_s25 + $0x88] sm:$0xff]   ;;  %v1973_v18 = vld [vmem:[%s2358_s25 + $0x90] sm:$0xff]   ;;  %v1974_v21 = vld [vmem:[%s2358_s25 + $0x58] sm:$0xff]   ;;  %v2429_v52 = vsub.s32 4, %v281_v46  ;;  %v2431_v54 = vsub.s32 6, %v281_v46  ;;  %v286_v57 = vsub.s32 1, %v281_v46 }
  0x61   : > { %1786 = vmatprep.subr.bf16.mxu0 %v1966_v10  ;;  %1808 = vmatprep.subr.bf16.mxu1 %v1967_v11  ;;  %v1975_v22 = vld [vmem:[%s2358_s25 + $0xd8] sm:$0xff]   ;;  %v1978_v25 = vld [vmem:[%s2358_s25 + $0x60] sm:$0xff]   ;;  %v1982_v30 = vld [vmem:[%s2358_s25 + $0x68] sm:$0xff]   ;;  %v294_v58 = vsub.s32 3, %v281_v46  ;;  %v282_v59 = vsub.s32 0, %v281_v46  ;;  %v290_v60 = vsub.s32 2, %v281_v46 }
  0x62   : > { %361 = vperm.xlu1 %1952, %v2375_v4   ;;  %276 = vperm.xlu0 %1951, %v2375_v4   ;;  %v1976_v23 = vld [vmem:[%s2358_s25 + $0x18] sm:$0xff]   ;;  %v1979_v26 = vld [vmem:[%s2358_s25 + $0xe0] sm:$0xff]   ;;  %v1983_v31 = vld [vmem:[%s2358_s25 + $0xe8] sm:$0xff]   ;;  %v302_v61 = vsub.s32 5, %v281_v46  ;;  %v310_v62 = vsub.s32 7, %v281_v46 }
  0x63   : > { %v1977_v24 = vld [vmem:[%s2358_s25 + $0x98] sm:$0xff]   ;;  %v1980_v27 = vld [vmem:[%s2358_s25 + $0x20] sm:$0xff]   ;;  %v1984_v32 = vld [vmem:[%s2358_s25 + $0x28] sm:$0xff]  }
  0x64   : > { %1787 = vmatpush3.bf16.msra.mxu0 %v1968_v12  ;;  %1809 = vmatpush3.bf16.msra.mxu1 %v1969_v13  ;;  %v1981_v29 = vld [vmem:[%s2358_s25 + $0xa0] sm:$0xff]   ;;  %v1985_v33 = vld [vmem:[%s2358_s25 + $0xa8] sm:$0xff]   ;;  %v1986_v34 = vld [vmem:[%s2358_s25 + $0x70] sm:$0xff]  }
  0x65   : > { %1788 = vmatprep.subr.bf16.mxu0 %v1970_v15  ;;  %1810 = vmatprep.subr.bf16.mxu1 %v1971_v16  ;;  %v1987_v35 = vld [vmem:[%s2358_s25 + $0xf0] sm:$0xff]   ;;  %v1990_v38 = vld [vmem:[%s2358_s25 + $0x78] sm:$0xff]   ;;  %v1994_v42 = vld [vmem:[%s2358_s25 + $0x140] sm:$0xff]  }
  0x66   : > { %1954 = vset.pattern.permute.xlu1 %v2179_v7  ;;  %1953 = vset.pattern.permute.xlu0 %v2179_v7  ;;  %v1988_v36 = vld [vmem:[%s2358_s25 + $0x30] sm:$0xff]   ;;  %v1991_v39 = vld [vmem:[%s2358_s25 + $0xf8] sm:$0xff]   ;;  %v1995_v43 = vld [vmem:[%s2358_s25 + $0x1c0] sm:$0xff]  }
  0x67   : > { %446 = vperm.xlu1 %1954, %v2375_v4   ;;  %442 = vperm.xlu0 %1953, %v2368_v1   ;;  %v1989_v37 = vld [vmem:[%s2358_s25 + $0xb0] sm:$0xff]   ;;  %v1992_v40 = vld [vmem:[%s2358_s25 + $0x38] sm:$0xff]  }
  0x68   : > { %1789 = vmatpush3.bf16.msra.mxu0 %v1972_v17  ;;  %1811 = vmatpush3.bf16.msra.mxu1 %v1973_v18  ;;  %v1993_v41 = vld [vmem:[%s2358_s25 + $0xb8] sm:$0xff]  }
  0x69   : > { %1790 = vmatprep.subr.bf16.mxu0 %v1974_v21  ;;  %1812 = vmatprep.subr.bf16.mxu1 %v1975_v22  ;;  %v1701_v45 = vld [vmem:[%s2352_s21 + $0x1] ss:$8 sm:$0xf]  ;;  %v266_v48 = vld [vmem:[%s2352_s21] ss:$8 sm:$0xf] }
  0x6a   : > { %v1702_v47 = vld [vmem:[%s2352_s21 + $0x1] ss:$8 sm:$0xf0]  ;;  %v267_v49 = vld [vmem:[%s2352_s21] ss:$8 sm:$0xf0] }
  0x6b   : > { %1955 = vset.pattern.permute.xlu1 %v2180_v14  ;;  %1956 = vset.pattern.permute.xlu0 %v2180_v14  ;;  %v1703_v50 = vld [vmem:[%s2352_s21 + $0x2] ss:$8 sm:$0xf]  ;;  %v355_v53 = vor.u32 %v1702_v47, %v1701_v45  ;;  %v268_v55 = vor.u32 %v267_v49, %v266_v48  ;;  %v1705_v0 = vld [vmem:[%s2352_s21 + $0x3] ss:$8 sm:$0xf] }
  0x6c   : > { %527 = vperm.xlu1 %1955, %v2368_v1   ;;  %531 = vperm.xlu0 %1956, %v2375_v4   ;;  %v1704_v51 = vld [vmem:[%s2352_s21 + $0x2] ss:$8 sm:$0xf0]  ;;  %v1707_v6 = vld [vmem:[%s2352_s21 + $0x4] ss:$8 sm:$0xf] }
  0x6d   : > { %1791 = vmatpush3.bf16.msra.mxu0 %v1976_v23  ;;  %1813 = vmatpush3.bf16.msra.mxu1 %v1977_v24  ;;  %v2433_v56 = vor.u32 %v1704_v51, %v1703_v50  ;;  %v2436_v63 = vrot.slane %v355_v53, %v2429_v52  ;;  %v2441_v2 = vrot.slane %v355_v53, %v2431_v54  ;;  %v1708_v7 = vld [vmem:[%s2352_s21 + $0x4] ss:$8 sm:$0xf0]  ;;  %v1709_v12 = vld [vmem:[%s2352_s21 + $0x5] ss:$8 sm:$0xf] }
  0x6e   : > { %1792 = vmatprep.subr.bf16.mxu0 %v1978_v25  ;;  %1814 = vmatprep.subr.bf16.mxu1 %v1979_v26  ;;  %v2444_v3 = vrot.slane %v268_v55, %v2429_v52  ;;  %v2459_v9 = vrot.slane %v268_v55, %v286_v57  ;;  %v2461_v10 = vrot.slane %v355_v53, %v286_v57  ;;  %v1710_v13 = vld [vmem:[%s2352_s21 + $0x5] ss:$8 sm:$0xf0]  ;;  %v1711_v15 = vld [vmem:[%s2352_s21 + $0x6] ss:$8 sm:$0xf] }
  0x6f   : > { %2946 = vst [vmem:[#allocation12_spill] sm:$0xff] %v2436_v63  ;;  %2947 = vst [vmem:[#allocation13_spill] sm:$0xff] %v2441_v2  ;;  %v2451_v5 = vrot.slane %v2433_v56, %v2429_v52  ;;  %v2457_v8 = vrot.slane %v2433_v56, %v2431_v54  ;;  %v2464_v11 = vrot.slane %v2433_v56, %v286_v57  ;;  %v1712_v16 = vld [vmem:[%s2352_s21 + $0x6] ss:$8 sm:$0xf0] }
  0x70   : > { %1957 = vset.pattern.permute.xlu1 %v2181_v19  ;;  %1958 = vset.pattern.permute.xlu0 %v2182_v20  ;;  %2948 = vst [vmem:[#allocation14_spill] sm:$0xff] %v2444_v3  ;;  %v295_v17 = vrot.slane %v268_v55, %v294_v58  ;;  %v380_v18 = vrot.slane %v355_v53, %v294_v58 }
  0x71   : > { %612 = vperm.xlu1 %1957, %v2368_v1   ;;  %697 = vperm.xlu0 %1958, %v2368_v1   ;;  %2950 = vst [vmem:[#allocation16_spill] sm:$0xff] %v2451_v5  ;;  %2951 = vst [vmem:[#allocation17_spill] sm:$0xff] %v2457_v8  ;;  %v2471_v19 = vrot.slane %v2433_v56, %v294_v58  ;;  %v283_v21 = vrot.slane %v268_v55, %v282_v59 }
  0x72   : > { %1793 = vmatpush3.bf16.msra.mxu0 %v1980_v27  ;;  %1815 = vmatpush3.bf16.msra.mxu1 %v1981_v29  ;;  %v368_v22 = vrot.slane %v355_v53, %v282_v59  ;;  %v2476_v23 = vrot.slane %v2433_v56, %v282_v59  ;;  %v2478_v24 = vor.u32 %v1710_v13, %v1709_v12 }
  0x73   : > { %1794 = vmatprep.subr.bf16.mxu0 %v1982_v30  ;;  %1816 = vmatprep.subr.bf16.mxu1 %v1983_v31  ;;  %v291_v25 = vrot.slane %v268_v55, %v290_v60  ;;  %v376_v26 = vrot.slane %v355_v53, %v290_v60  ;;  %v2481_v27 = vrot.slane %v2433_v56, %v290_v60 }
  0x74   : > { %2952 = vst [vmem:[#allocation18_spill] sm:$0xff] %v2478_v24  ;;  %v2485_v29 = vrot.slane %v268_v55, %v302_v61  ;;  %v2487_v30 = vrot.slane %v355_v53, %v302_v61  ;;  %v2489_v31 = vrot.slane %v268_v55, %v310_v62  ;;  %v2539_v50 = vrot.slane %v2478_v24, %v290_v60 }
  0x75   : > { %616 = vperm.xlu1 %1957, %v2375_v4   ;;  %1961 = vset.pattern.permute.xlu0 %v2183_v28 }
  0x76   : > { %786 = vperm.xlu0 %1961, %v2375_v4   ;;  %1795 = vmatpush3.bf16.msra.mxu0 %v1984_v32  ;;  %2954 = vst [vmem:[#allocation20_spill] sm:$0xff] %v2489_v31 }
  0x77   : > { %1817 = vmatpush3.bf16.msra.mxu1 %v1985_v33  ;;  %1796 = vmatprep.subr.bf16.mxu0 %v1986_v34  ;;  %v2496_v34 = vrot.slane %v2433_v56, %v302_v61 }
  0x78   : > { %1818 = vmatprep.subr.bf16.mxu1 %v1987_v35  ;;  %v2498_v35 = vrot.slane %v355_v53, %v310_v62 }
  0x79   : > { %1959 = vset.pattern.permute.xlu1 %v2182_v20  ;;  %v2473_v20 = vor.u32 %v1708_v7, %v1707_v6 }
  0x7a   : > { %701 = vperm.xlu1 %1959, %v2375_v4   ;;  %1797 = vmatpush3.bf16.msra.mxu0 %v1988_v36  ;;  %v2447_v4 = vrot.slane %v268_v55, %v2431_v54  ;;  %2955 = vst [vmem:[#allocation21_spill] sm:$0xff] %v2498_v35 }
  0x7b   : > { %1819 = vmatpush3.bf16.msra.mxu1 %v1989_v37  ;;  %1798 = vmatprep.subr.bf16.mxu0 %v1990_v38  ;;  %v2501_v36 = vrot.slane %v2473_v20, %v286_v57  ;;  %v2504_v37 = vrot.slane %v2473_v20, %v294_v58  ;;  %v2532_v47 = vrot.slane %v2473_v20, %v290_v60 }
  0x7c   : > { %1820 = vmatprep.subr.bf16.mxu1 %v1991_v39  ;;  %2949 = vst [vmem:[#allocation15_spill] sm:$0xff] %v2447_v4  ;;  %v2509_v39 = vrot.slane %v2473_v20, %v282_v59  ;;  %v2547_v55 = vrot.slane %v2473_v20, %v302_v61  ;;  %v2578_v12 = vrot.slane %v2473_v20, %v2429_v52 }
  0x7e   : > { %1960 = vset.pattern.permute.xlu1 %v2183_v28  ;;  %1799 = vmatpush3.bf16.msra.mxu0 %v1992_v40  ;;  %v2483_v28 = vor.u32 %v1712_v16, %v1711_v15  ;;  %v2512_v40 = vrot.slane %v2478_v24, %v286_v57  ;;  %2963 = vst [vmem:[#allocation29_spill] sm:$0xff] %v2578_v12 }
  0x7f   : > { %782 = vperm.xlu1 %1960, %v2368_v1   ;;  %1821 = vmatpush3.bf16.msra.mxu1 %v1993_v41  ;;  %v1706_v1 = vld [vmem:[%s2352_s21 + $0x3] ss:$8 sm:$0xf0]  ;;  %v2515_v41 = vrot.slane %v2478_v24, %v294_v58 }
  0x80   : > { %1828 = vmatprep.subr.bf16.mxu0 %v1994_v42  ;;  %1850 = vmatprep.subr.bf16.mxu1 %v1995_v43  ;;  %v525_v14 = vor.u32 %v1706_v1, %v1705_v0  ;;  %2953 = vst [vmem:[#allocation19_spill] sm:$0xff] %v2483_v28  ;;  %v2518_v42 = vrot.slane %v2478_v24, %v282_v59 }
  0x81   : > { %v2523_v44 = vrot.slane %v2483_v28, %v286_v57  ;;  %v2526_v45 = vrot.slane %v2483_v28, %v294_v58  ;;  %v2529_v46 = vrot.slane %v2483_v28, %v282_v59  ;;  %v2542_v51 = vrot.slane %v2483_v28, %v290_v60 }
  0x82   : > { %v2491_v32 = vrot.slane %v525_v14, %v286_v57  ;;  %v2493_v33 = vrot.slane %v525_v14, %v294_v58  ;;  %v2506_v38 = vrot.slane %v525_v14, %v282_v59  ;;  %v2520_v43 = vrot.slane %v525_v14, %v290_v60 }
  0x83   : > { %v2544_v53 = vrot.slane %v525_v14, %v302_v61  ;;  %v2550_v57 = vrot.slane %v2478_v24, %v302_v61  ;;  %v2553_v58 = vrot.slane %v2483_v28, %v302_v61  ;;  %v2556_v59 = vrot.slane %v2433_v56, %v310_v62 }
  0x84   : > { %v2558_v0 = vrot.slane %v525_v14, %v310_v62  ;;  %v2561_v1 = vrot.slane %v2473_v20, %v310_v62  ;;  %v2564_v60 = vrot.slane %v2478_v24, %v310_v62  ;;  %v2567_v6 = vrot.slane %v2483_v28, %v310_v62 }
  0x85   : > { %2957 = vst [vmem:[#allocation23_spill] sm:$0xff] %v2556_v59  ;;  %v2570_v7 = vrot.slane %v525_v14, %v2429_v52  ;;  %v2581_v13 = vrot.slane %v525_v14, %v2431_v54 }
  0x86   : > { %2958 = vst [vmem:[#allocation24_spill] sm:$0xff] %v2558_v0  ;;  %2959 = vst [vmem:[#allocation25_spill] sm:$0xff] %v2561_v1  ;;  %v2607_v1 = vrot.slane %v2478_v24, %v2429_v52  ;;  %v2611_v0 = vrot.slane %v2473_v20, %v2431_v54 }
  0x87   : > { %2960 = vst [vmem:[#allocation26_spill] sm:$0xff] %v2564_v60  ;;  %2961 = vst [vmem:[#allocation27_spill] sm:$0xff] %v2567_v6 }
  0x88   : > { %2962 = vst [vmem:[#allocation28_spill] sm:$0xff] %v2570_v7  ;;  %2964 = vst [vmem:[#allocation30_spill] sm:$0xff] %v2581_v13 }
  0x89   : > { %2965 = vst [vmem:[#allocation31_spill] sm:$0xff] %v2607_v1 }
  0xdd   : > { %v2534_v48 = vpop.permute.xlu1 %357  ;;  %v2536_v49 = vpop.permute.xlu0 %271 }
  0xde   : > { %2956 = vst [vmem:[#allocation22_spill] sm:$0xff] %v2534_v48  ;;  %v321_v61 = vmul.f32 %v2459_v9, %v2536_v49  ;;  %v406_v56 = vmul.f32 %v2461_v10, %v2534_v48  ;;  %v323_v16 = vmul.f32 %v295_v17, %v2536_v49  ;;  %v408_v7 = vmul.f32 %v380_v18, %v2534_v48 }
  0xdf   : > { %v320_v8 = vmul.f32 %v283_v21, %v2536_v49  ;;  %v405_v5 = vmul.f32 %v368_v22, %v2534_v48  ;;  %v322_v4 = vmul.f32 %v291_v25, %v2536_v49  ;;  %v407_v3 = vmul.f32 %v376_v26, %v2534_v48 }
  0xe0   : > { %v325_v14 = vmul.f32 %v2485_v29, %v2536_v49  ;;  %v410_v12 = vmul.f32 %v2487_v30, %v2534_v48  ;;  %v424_v59 = vadd.f32 %v408_v7, %v323_v16 }
  0xe1   : > { %v2583_v15 = vpop.permute.xlu1 %361  ;;  %v2585_v62 = vpop.permute.xlu0 %276  ;;  %v421_v48 = vadd.f32 %v405_v5, %v320_v8  ;;  %v423_v31 = vadd.f32 %v407_v3, %v322_v4 }
  0xe2   : > { %v329_v13 = vmul.f32 %v2459_v9, %v2585_v62  ;;  %v414_v6 = vmul.f32 %v2461_v10, %v2583_v15  ;;  %v331_v2 = vmul.f32 %v295_v17, %v2585_v62  ;;  %v416_v63 = vmul.f32 %v380_v18, %v2583_v15 }
  0xe3   : > { %v328_v60 = vmul.f32 %v283_v21, %v2585_v62  ;;  %v413_v28 = vmul.f32 %v368_v22, %v2583_v15  ;;  %v422_v9 = vadd.f32 %v406_v56, %v321_v61  ;;  %v330_v10 = vmul.f32 %v291_v25, %v2585_v62 }
  0xe4   : > { %v415_v17 = vmul.f32 %v376_v26, %v2583_v15  ;;  %v430_v21 = vadd.f32 %v414_v6, %v329_v13  ;;  %v432_v22 = vadd.f32 %v416_v63, %v331_v2  ;;  %v333_v1 = vmul.f32 %v2485_v29, %v2585_v62 }
  0xe5   : > { %v429_v24 = vadd.f32 %v413_v28, %v328_v60  ;;  %v418_v20 = vmul.f32 %v2487_v30, %v2583_v15  ;;  %v426_v7 = vadd.f32 %v410_v12, %v325_v14 }
  0xe6   : > { %v2615_v35 = vpop.permute.xlu1 %446  ;;  %v2617_v18 = vpop.permute.xlu0 %442  ;;  %v431_v4 = vadd.f32 %v415_v17, %v330_v10 }
  0xe7   : > { %v491_v25 = vmul.f32 %v2464_v11, %v2617_v18  ;;  %v499_v26 = vmul.f32 %v2464_v11, %v2615_v35  ;;  %v493_v6 = vmul.f32 %v2471_v19, %v2617_v18  ;;  %v501_v63 = vmul.f32 %v2471_v19, %v2615_v35 }
  0xe8   : > { %v490_v2 = vmul.f32 %v2476_v23, %v2617_v18  ;;  %v498_v3 = vmul.f32 %v2476_v23, %v2615_v35  ;;  %v492_v5 = vmul.f32 %v2481_v27, %v2617_v18  ;;  %v500_v56 = vmul.f32 %v2481_v27, %v2615_v35 }
  0xe9   : > { %v507_v8 = vadd.f32 %v491_v25, %v422_v9  ;;  %v515_v28 = vadd.f32 %v499_v26, %v430_v21  ;;  %v509_v29 = vadd.f32 %v493_v6, %v424_v59  ;;  %v517_v11 = vadd.f32 %v501_v63, %v432_v22 }
  0xea   : > { %v506_v61 = vadd.f32 %v490_v2, %v421_v48  ;;  %v514_v19 = vadd.f32 %v498_v3, %v429_v24  ;;  %v508_v12 = vadd.f32 %v492_v5, %v423_v31  ;;  %v516_v27 = vadd.f32 %v500_v56, %v431_v4 }
  0xeb   : > { %v2637_v30 = vpop.permute.xlu1 %527  ;;  %v2639_v60 = vpop.permute.xlu0 %531  ;;  %v434_v6 = vadd.f32 %v418_v20, %v333_v1  ;;  %v503_v63 = vmul.f32 %v2496_v34, %v2615_v35 }
  0xec   : > { %v576_v23 = vmul.f32 %v2491_v32, %v2637_v30  ;;  %v584_v13 = vmul.f32 %v2491_v32, %v2639_v60  ;;  %v578_v59 = vmul.f32 %v2493_v33, %v2637_v30  ;;  %v586_v16 = vmul.f32 %v2493_v33, %v2639_v60 }
  0xed   : > { %v575_v48 = vmul.f32 %v2506_v38, %v2637_v30  ;;  %v583_v24 = vmul.f32 %v2506_v38, %v2639_v60  ;;  %v577_v31 = vmul.f32 %v2520_v43, %v2637_v30  ;;  %v585_v22 = vmul.f32 %v2520_v43, %v2639_v60 }
  0xee   : > { %v592_v14 = vadd.f32 %v576_v23, %v507_v8  ;;  %v600_v9 = vadd.f32 %v584_v13, %v515_v28  ;;  %v594_v10 = vadd.f32 %v578_v59, %v509_v29  ;;  %v602_v32 = vadd.f32 %v586_v16, %v517_v11 }
  0xef   : > { %v591_v17 = vadd.f32 %v575_v48, %v506_v61  ;;  %v599_v21 = vadd.f32 %v583_v24, %v514_v19  ;;  %v593_v33 = vadd.f32 %v577_v31, %v508_v12  ;;  %v495_v38 = vmul.f32 %v2496_v34, %v2617_v18 }
  0xf0   : > { %v2659_v25 = vpop.permute.xlu1 %612  ;;  %v2661_v26 = vpop.permute.xlu0 %697  ;;  %v580_v2 = vmul.f32 %v2544_v53, %v2637_v30  ;;  %v601_v5 = vadd.f32 %v585_v22, %v516_v27  ;;  %v519_v23 = vadd.f32 %v503_v63, %v434_v6  ;;  %v588_v13 = vmul.f32 %v2544_v53, %v2639_v60 }
  0xf1   : > { %v661_v3 = vmul.f32 %v2501_v36, %v2659_v25  ;;  %v746_v43 = vmul.f32 %v2512_v40, %v2661_v26  ;;  %v663_v4 = vmul.f32 %v2504_v37, %v2659_v25  ;;  %v748_v1 = vmul.f32 %v2515_v41, %v2661_v26 }
  0xf2   : > { %v660_v20 = vmul.f32 %v2509_v39, %v2659_v25  ;;  %v745_v34 = vmul.f32 %v2518_v42, %v2661_v26  ;;  %v662_v8 = vmul.f32 %v2532_v47, %v2659_v25  ;;  %v747_v11 = vmul.f32 %v2539_v50, %v2661_v26 }
  0xf3   : > { %v677_v28 = vadd.f32 %v661_v3, %v592_v14  ;;  %v679_v29 = vadd.f32 %v663_v4, %v594_v10  ;;  %v511_v61 = vadd.f32 %v495_v38, %v426_v7 }
  0xf4   : > { %v2685_v19 = vpop.permute.xlu1 %616  ;;  %v676_v56 = vadd.f32 %v660_v20, %v591_v17  ;;  %v678_v12 = vadd.f32 %v662_v8, %v593_v33  ;;  %v750_v20 = vmul.f32 %v2550_v57, %v2661_v26 }
  0xf5   : > { %v2689_v59 = vpop.permute.xlu0 %786  ;;  %v669_v16 = vmul.f32 %v2501_v36, %v2685_v19  ;;  %v762_v48 = vadd.f32 %v746_v43, %v677_v28  ;;  %v671_v24 = vmul.f32 %v2504_v37, %v2685_v19  ;;  %v764_v27 = vadd.f32 %v748_v1, %v679_v29  ;;  %v2966_v29 = vld [vmem:[#allocation20_spill] sm:$0xff] }
  0xf6   : > { %v839_v7 = vmul.f32 %v2523_v44, %v2689_v59  ;;  %v841_v31 = vmul.f32 %v2526_v45, %v2689_v59  ;;  %v668_v14 = vmul.f32 %v2509_v39, %v2685_v19  ;;  %v761_v53 = vadd.f32 %v745_v34, %v676_v56 }
  0xf7   : > { %v685_v10 = vadd.f32 %v669_v16, %v600_v9  ;;  %v687_v17 = vadd.f32 %v671_v24, %v602_v32  ;;  %v838_v36 = vmul.f32 %v2529_v46, %v2689_v59  ;;  %v670_v22 = vmul.f32 %v2532_v47, %v2685_v19 }
  0xf8   : > { %v684_v37 = vadd.f32 %v668_v14, %v599_v21  ;;  %v763_v33 = vadd.f32 %v747_v11, %v678_v12  ;;  %v840_v6 = vmul.f32 %v2542_v51, %v2689_v59  ;;  %v596_v38 = vadd.f32 %v580_v2, %v511_v61 }
  0xf9   : > { %v2707_v63 = vpop.permute.xlu1 %701  ;;  %v686_v3 = vadd.f32 %v670_v22, %v601_v5  ;;  %v604_v43 = vadd.f32 %v588_v13, %v519_v23  ;;  %v665_v39 = vmul.f32 %v2547_v55, %v2659_v25  ;;  %v673_v9 = vmul.f32 %v2547_v55, %v2685_v19 }
  0xfa   : > { %v754_v32 = vmul.f32 %v2512_v40, %v2707_v63  ;;  %v756_v47 = vmul.f32 %v2515_v41, %v2707_v63  ;;  %v753_v21 = vmul.f32 %v2518_v42, %v2707_v63  ;;  %v755_v2 = vmul.f32 %v2539_v50, %v2707_v63 }
  0xfb   : > { %v681_v4 = vadd.f32 %v665_v39, %v596_v38  ;;  %v689_v1 = vadd.f32 %v673_v9, %v604_v43  ;;  %v758_v55 = vmul.f32 %v2550_v57, %v2707_v63  ;;  %v843_v42 = vmul.f32 %v2553_v58, %v2689_v59  ;;  %v2968_v38 = vld [vmem:[#allocation21_spill] sm:$0xff] }
  0xfc   : > { %v770_v34 = vadd.f32 %v754_v32, %v685_v10  ;;  %v772_v5 = vadd.f32 %v756_v47, %v687_v17  ;;  %v769_v40 = vadd.f32 %v753_v21, %v684_v37  ;;  %v771_v8 = vadd.f32 %v755_v2, %v686_v3  ;;  %v1996_v2 = vld [vmem:[%s2358_s25 + $0x100] sm:$0xff]  }
  0xfd   : > { %v766_v28 = vadd.f32 %v750_v20, %v681_v4  ;;  %v774_v41 = vadd.f32 %v758_v55, %v689_v1  ;;  %v327_v50 = vmul.f32 %v2966_v29, %v2536_v49  ;;  %v1997_v4 = vld [vmem:[%s2358_s25 + $0x180] sm:$0xff]   ;;  %v2969_v55 = vld [vmem:[#allocation23_spill] sm:$0xff] }
  0xfe   : > { %v2729_v11 = vpop.permute.xlu1 %782  ;;  %v855_v61 = vadd.f32 %v839_v7, %v770_v34  ;;  %v857_v56 = vadd.f32 %v841_v31, %v772_v5  ;;  %v854_v12 = vadd.f32 %v838_v36, %v769_v40  ;;  %v856_v23 = vadd.f32 %v840_v6, %v771_v8  ;;  %v2970_v40 = vld [vmem:[#allocation24_spill] sm:$0xff] }
  0xff   : > { %v831_v57 = vmul.f32 %v2523_v44, %v2729_v11  ;;  %v833_v13 = vmul.f32 %v2526_v45, %v2729_v11  ;;  %v830_v16 = vmul.f32 %v2529_v46, %v2729_v11  ;;  %v832_v24 = vmul.f32 %v2542_v51, %v2729_v11  ;;  %v2967_v46 = vld [vmem:[#allocation22_spill] sm:$0xff] }
 0x100   : > { %v871_v14 = vmax.f32 %v855_v61, 0.0  ;;  %v873_v10 = vmax.f32 %v857_v56, 0.0  ;;  %v870_v17 = vmax.f32 %v854_v12, 0.0  ;;  %v872_v22 = vmax.f32 %v856_v23, 0.0 }
 0x101   : > { %v847_v7 = vadd.f32 %v831_v57, %v762_v48  ;;  %v849_v31 = vadd.f32 %v833_v13, %v764_v27  ;;  %v846_v36 = vadd.f32 %v830_v16, %v761_v53  ;;  %v848_v37 = vadd.f32 %v832_v24, %v763_v33  ;;  %v2000_v57 = vld [vmem:[%s2358_s25 + $0x108] sm:$0xff]  }
 0x102   : > { %v835_v44 = vmul.f32 %v2553_v58, %v2729_v11  ;;  %v859_v6 = vadd.f32 %v843_v42, %v774_v41  ;;  %v335_v45 = vmul.f32 %v2966_v29, %v2585_v62  ;;  %v412_v51 = vmul.f32 %v2968_v38, %v2967_v46  ;;  %v2971_v41 = vld [vmem:[#allocation25_spill] sm:$0xff]  ;;  %v1998_v29 = vld [vmem:[%s2358_s25 + $0x148] sm:$0xff]  }
 0x103   : > { %v863_v3 = vmax.f32 %v847_v7, 0.0  ;;  %v865_v43 = vmax.f32 %v849_v31, 0.0  ;;  %v862_v39 = vmax.f32 %v846_v36, 0.0  ;;  %v864_v9 = vmax.f32 %v848_v37, 0.0  ;;  %v2001_v13 = vld [vmem:[%s2358_s25 + $0x188] sm:$0xff]   ;;  %v2974_v7 = vld [vmem:[#allocation26_spill] sm:$0xff] }
 0x104   : > { %v851_v48 = vadd.f32 %v835_v44, %v766_v28  ;;  %v875_v27 = vmax.f32 %v859_v6, 0.0  ;;  %v420_v53 = vmul.f32 %v2968_v38, %v2583_v15  ;;  %v428_v33 = vadd.f32 %v412_v51, %v327_v50  ;;  %v1999_v50 = vld [vmem:[%s2358_s25 + $0x1c8] sm:$0xff]   ;;  %v2002_v37 = vld [vmem:[%s2358_s25 + $0x150] sm:$0xff]  }
 0x105   : > { %v879_v58 = vpack.c.bf16 %v871_v14, %v863_v3  ;;  %v881_v32 = vpack.c.bf16 %v873_v10, %v865_v43  ;;  %v878_v47 = vpack.c.bf16 %v870_v17, %v862_v39  ;;  %v880_v21 = vpack.c.bf16 %v872_v22, %v864_v9  ;;  %v2972_v16 = vld [vmem:[#allocation19_spill] sm:$0xff]  ;;  %v2973_v14 = vld [vmem:[#allocation18_spill] sm:$0xff]  ;;  %v2003_v44 = vld [vmem:[%s2358_s25 + $0x1d0] sm:$0xff]  }
 0x106   : > { %v867_v1 = vmax.f32 %v851_v48, 0.0  ;;  %v436_v20 = vadd.f32 %v420_v53, %v335_v45  ;;  %v497_v34 = vmul.f32 %v2969_v55, %v2617_v18  ;;  %v505_v5 = vmul.f32 %v2969_v55, %v2615_v35  ;;  %v2975_v6 = vld [vmem:[#allocation12_spill] sm:$0xff]  ;;  %v2976_v45 = vld [vmem:[#allocation13_spill] sm:$0xff]  ;;  %v2977_v39 = vld [vmem:[#allocation27_spill] sm:$0xff] }
 0x107   : > { %1432 = vmatprep.mubr.bf16.mxu0 %v879_v58  ;;  %1473 = vmatprep.mubr.bf16.mxu1 %v881_v32  ;;  %v582_v8 = vmul.f32 %v2970_v40, %v2637_v30  ;;  %v590_v28 = vmul.f32 %v2970_v40, %v2639_v60  ;;  %v667_v42 = vmul.f32 %v2971_v41, %v2659_v25  ;;  %v2005_v58 = vld [vmem:[%s2358_s25 + $0x190] sm:$0xff]   ;;  %v2979_v32 = vld [vmem:[#allocation15_spill] sm:$0xff]  ;;  %v2981_v40 = vld [vmem:[#allocation17_spill] sm:$0xff] }
 0x108   : > { %1433 = vmatmul.mubr.bf16.vlgmr.msra.gmra.mrb[0].mxu0 %v878_v47  ;;  %1474 = vmatmul.mubr.bf16.vlgmr.msra.gmra.mrb[0].mxu1 %v880_v21  ;;  %v883_v61 = vpack.c.bf16 %v875_v27, %v867_v1  ;;  %v513_v56 = vadd.f32 %v497_v34, %v428_v33  ;;  %v521_v12 = vadd.f32 %v505_v5, %v436_v20  ;;  %v2978_v27 = vld [vmem:[#allocation14_spill] sm:$0xff]  ;;  %v2004_v33 = vld [vmem:[%s2358_s25 + $0x110] sm:$0xff]   ;;  %v2007_v1 = vld [vmem:[%s2358_s25 + $0x1d8] sm:$0xff]  }
 0x109   : > { %1829 = vmatpush3.bf16.msra.mxu0 %v1996_v2  ;;  %1851 = vmatpush3.bf16.msra.mxu1 %v1997_v4  ;;  %v675_v23 = vmul.f32 %v2971_v41, %v2685_v19  ;;  %v2767_v24 = vrot.slane %v2972_v16, %v2429_v52  ;;  %v2771_v10 = vrot.slane %v2973_v14, %v2431_v54  ;;  %v2006_v4 = vld [vmem:[%s2358_s25 + $0x158] sm:$0xff]   ;;  %v2980_v34 = vld [vmem:[#allocation16_spill] sm:$0xff] }
 0x10a   : > { %1514 = vmatprep.mubr.bf16.mxu0 %v883_v61  ;;  %v598_v17 = vadd.f32 %v582_v8, %v513_v56  ;;  %v606_v22 = vadd.f32 %v590_v28, %v521_v12  ;;  %v752_v31 = vmul.f32 %v2974_v7, %v2661_v26  ;;  %v760_v36 = vmul.f32 %v2974_v7, %v2707_v63  ;;  %v2982_v61 = vld [vmem:[#allocation28_spill] sm:$0xff] }
 0x10b   : > { %v409_v52 = vmul.f32 %v2975_v6, %v2967_v46  ;;  %v411_v38 = vmul.f32 %v2976_v45, %v2967_v46  ;;  %1830 = vmatprep.subr.bf16.mxu0 %v1998_v29  ;;  %1852 = vmatprep.subr.bf16.mxu1 %v1999_v50  ;;  %v2785_v51 = vrot.slane %v2972_v16, %v2431_v54  ;;  %v2011_v16 = vld [vmem:[%s2358_s25 + $0x1e0] sm:$0xff]  }
 0x10c   : > { %v683_v3 = vadd.f32 %v667_v42, %v598_v17  ;;  %v691_v43 = vadd.f32 %v675_v23, %v606_v22  ;;  %v837_v9 = vmul.f32 %v2977_v39, %v2729_v11  ;;  %v845_v48 = vmul.f32 %v2977_v39, %v2689_v59  ;;  %v2984_v22 = vld [vmem:[#allocation29_spill] sm:$0xff]  ;;  %v2015_v39 = vld [vmem:[%s2358_s25 + $0x1e8] sm:$0xff]  }
 0x10d   : > { %v324_v53 = vmul.f32 %v2978_v27, %v2536_v49  ;;  %v417_v46 = vmul.f32 %v2975_v6, %v2583_v15  ;;  %v332_v54 = vmul.f32 %v2978_v27, %v2585_v62  ;;  %1831 = vmatpush3.bf16.msra.mxu0 %v2000_v57  ;;  %1853 = vmatpush3.bf16.msra.mxu1 %v2001_v13  ;;  %v2983_v57 = vld [vmem:[#allocation30_spill] sm:$0xff] }
 0x10e   : > { %v326_v47 = vmul.f32 %v2979_v32, %v2536_v49  ;;  %v768_v21 = vadd.f32 %v752_v31, %v683_v3  ;;  %v776_v2 = vadd.f32 %v760_v36, %v691_v43  ;;  %1832 = vmatprep.subr.bf16.mxu0 %v2002_v37  ;;  %1854 = vmatprep.subr.bf16.mxu1 %v2003_v44  ;;  %v2014_v43 = vld [vmem:[%s2358_s25 + $0x168] sm:$0xff]  }
 0x10f   : > { %v419_v20 = vmul.f32 %v2976_v45, %v2583_v15  ;;  %v334_v55 = vmul.f32 %v2979_v32, %v2585_v62  ;;  %v502_v5 = vmul.f32 %v2980_v34, %v2615_v35  ;;  %v494_v49 = vmul.f32 %v2980_v34, %v2617_v18  ;;  %v2008_v15 = vld [vmem:[%s2358_s25 + $0x118] sm:$0xff]  }
 0x110   : > { %v504_v8 = vmul.f32 %v2981_v40, %v2615_v35  ;;  %v496_v28 = vmul.f32 %v2981_v40, %v2617_v18  ;;  %v853_v41 = vadd.f32 %v837_v9, %v768_v21  ;;  %v861_v42 = vadd.f32 %v845_v48, %v776_v2  ;;  %v2009_v62 = vld [vmem:[%s2358_s25 + $0x198] sm:$0xff]   ;;  %v2010_v35 = vld [vmem:[%s2358_s25 + $0x160] sm:$0xff]   ;;  %v2018_v2 = vld [vmem:[%s2358_s25 + $0x170] sm:$0xff]  }
 0x111   : > { %1833 = vmatpush3.bf16.msra.mxu0 %v2004_v33  ;;  %1855 = vmatpush3.bf16.msra.mxu1 %v2005_v58  ;;  %v425_v29 = vadd.f32 %v409_v52, %v324_v53  ;;  %v433_v50 = vadd.f32 %v417_v46, %v332_v54  ;;  %v579_v56 = vmul.f32 %v2982_v61, %v2637_v30  ;;  %v2013_v52 = vld [vmem:[%s2358_s25 + $0x1a0] sm:$0xff]   ;;  %v2985_v53 = vld [vmem:[#allocation31_spill] sm:$0xff]  ;;  %v2020_v40 = vld [vmem:[%s2358_s25 + $0x130] sm:$0xff]  }
 0x112   : > { %v869_v12 = vmax.f32 %v853_v41, 0.0  ;;  %v877_v23 = vmax.f32 %v861_v42, 0.0  ;;  %1834 = vmatprep.subr.bf16.mxu0 %v2006_v4  ;;  %1856 = vmatprep.subr.bf16.mxu1 %v2007_v1  ;;  %v427_v18 = vadd.f32 %v411_v38, %v326_v47  ;;  %v581_v13 = vmul.f32 %v2983_v57, %v2637_v30  ;;  %v2012_v30 = vld [vmem:[%s2358_s25 + $0x120] sm:$0xff]   ;;  %v2019_v4 = vld [vmem:[%s2358_s25 + $0x1f0] sm:$0xff]  }
 0x113   : > { %v510_v14 = vadd.f32 %v494_v49, %v425_v29  ;;  %v587_v17 = vmul.f32 %v2982_v61, %v2639_v60  ;;  %v664_v7 = vmul.f32 %v2984_v22, %v2659_v25  ;;  %v435_v31 = vadd.f32 %v419_v20, %v334_v55  ;;  %v2025_v29 = vld [vmem:[%s2358_s25 + $0x1b8] sm:$0xff]  }
 0x114   : > { %v885_v36 = vpack.c.bf16 %v877_v23, %v869_v12  ;;  %v512_v37 = vadd.f32 %v496_v28, %v427_v18  ;;  %v589_v44 = vmul.f32 %v2983_v57, %v2639_v60  ;;  %v666_v6 = vmul.f32 %v2611_v0, %v2659_v25  ;;  %v2022_v28 = vld [vmem:[%s2358_s25 + $0x178] sm:$0xff]  }
 0x115   : > { %1835 = vmatpush3.bf16.msra.mxu0 %v2008_v15  ;;  %1857 = vmatpush3.bf16.msra.mxu1 %v2009_v62  ;;  %v518_v45 = vadd.f32 %v502_v5, %v433_v50  ;;  %v595_v38 = vadd.f32 %v579_v56, %v510_v14  ;;  %v672_v3 = vmul.f32 %v2984_v22, %v2685_v19  ;;  %v2024_v62 = vld [vmem:[%s2358_s25 + $0x138] sm:$0xff]  }
 0x116   : > { %1555 = vmatprep.mubr.bf16.mxu1 %v885_v36  ;;  %1836 = vmatprep.subr.bf16.mxu0 %v2010_v35  ;;  %v520_v9 = vadd.f32 %v504_v8, %v435_v31  ;;  %v597_v60 = vadd.f32 %v581_v13, %v512_v37  ;;  %v674_v25 = vmul.f32 %v2611_v0, %v2685_v19  ;;  %v2016_v0 = vld [vmem:[%s2358_s25 + $0x128] sm:$0xff]   ;;  %v2021_v8 = vld [vmem:[%s2358_s25 + $0x1b0] sm:$0xff]  }
 0x117   : > { %1858 = vmatprep.subr.bf16.mxu1 %v2011_v16  ;;  %v603_v48 = vadd.f32 %v587_v17, %v518_v45  ;;  %v680_v27 = vadd.f32 %v664_v7, %v595_v38  ;;  %v749_v46 = vmul.f32 %v2985_v53, %v2661_v26  ;;  %v757_v54 = vmul.f32 %v2985_v53, %v2707_v63  ;;  %v2017_v19 = vld [vmem:[%s2358_s25 + $0x1a8] sm:$0xff]   ;;  %v886_v53 = vld [vmem:[#allocation2] sm:$0xff] }
 0x118   : > { %v605_v33 = vadd.f32 %v589_v44, %v520_v9  ;;  %v682_v58 = vadd.f32 %v666_v6, %v597_v60  ;;  %v751_v32 = vmul.f32 %v2771_v10, %v2661_v26  ;;  %v759_v47 = vmul.f32 %v2771_v10, %v2707_v63 }
 0x119   : > { %1837 = vmatpush3.bf16.msra.mxu0 %v2012_v30  ;;  %1859 = vmatpush3.bf16.msra.mxu1 %v2013_v52  ;;  %v834_v21 = vmul.f32 %v2767_v24, %v2729_v11  ;;  %v688_v1 = vadd.f32 %v672_v3, %v603_v48  ;;  %v836_v63 = vmul.f32 %v2785_v51, %v2729_v11  ;;  %v2023_v11 = vld [vmem:[%s2358_s25 + $0x1f8] sm:$0xff]  }
 0x11a   : > { %1838 = vmatprep.subr.bf16.mxu0 %v2014_v43  ;;  %1860 = vmatprep.subr.bf16.mxu1 %v2015_v39  ;;  %v690_v26 = vadd.f32 %v674_v25, %v605_v33  ;;  %v765_v10 = vadd.f32 %v749_v46, %v680_v27  ;;  %v842_v20 = vmul.f32 %v2767_v24, %v2689_v59  ;;  %v887_v33 = vld [vmem:[#allocation2 + $0x8] sm:$0xff] }
 0x11b   : > { %v773_v55 = vadd.f32 %v757_v54, %v688_v1  ;;  %v767_v34 = vadd.f32 %v751_v32, %v682_v58  ;;  %v844_v49 = vmul.f32 %v2785_v51, %v2689_v59 }
 0x11c   : > { %v775_v5 = vadd.f32 %v759_v47, %v690_v26  ;;  %v850_v41 = vadd.f32 %v834_v21, %v765_v10 }
 0x11d   : > { %1839 = vmatpush3.bf16.msra.mxu0 %v2016_v0  ;;  %1861 = vmatpush3.bf16.msra.mxu1 %v2017_v19  ;;  %v852_v42 = vadd.f32 %v836_v63, %v767_v34  ;;  %v858_v15 = vadd.f32 %v842_v20, %v773_v55 }
 0x11e   : > { %1840 = vmatprep.subr.bf16.mxu0 %v2018_v2  ;;  %1862 = vmatprep.subr.bf16.mxu1 %v2019_v4  ;;  %v860_v24 = vadd.f32 %v844_v49, %v775_v5  ;;  %v866_v59 = vmax.f32 %v850_v41, 0.0 }
 0x11f   : > { %v868_v51 = vmax.f32 %v852_v42, 0.0  ;;  %v874_v50 = vmax.f32 %v858_v15, 0.0 }
 0x120   : > { %v876_v61 = vmax.f32 %v860_v24, 0.0 }
 0x121   : > { %1841 = vmatpush3.bf16.msra.mxu0 %v2020_v40  ;;  %1863 = vmatpush3.bf16.msra.mxu1 %v2021_v8  ;;  %v882_v56 = vpack.c.bf16 %v874_v50, %v866_v59 }
 0x122   : > { %1842 = vmatprep.subr.bf16.mxu0 %v2022_v28  ;;  %1864 = vmatprep.subr.bf16.mxu1 %v2023_v11  ;;  %v884_v12 = vpack.c.bf16 %v876_v61, %v868_v51 }
 0x125   : > { %1843 = vmatpush3.bf16.msra.mxu0 %v2024_v62  ;;  %1865 = vmatpush3.bf16.msra.mxu1 %v2025_v29 }
 0x128   : > { %1515 = vmatmul.mubr.bf16.vlgmr.msra.gmra.mrb[4].mxu0 %v882_v56  ;;  %1556 = vmatmul.mubr.bf16.vlgmr.msra.gmra.mrb[4].mxu1 %v884_v12 }
 0x1db   : > { %v1800_v23 = vpop.f32.mrb[0].mxu0  ;;  %v1822_v35 = vpop.f32.mrb[0].mxu1 }
 0x1dc   : > { %v1801_v18 = vpop.f32.mrb[1].mxu0  ;;  %v1823_v57 = vpop.f32.mrb[1].mxu1 }
 0x1dd   : > { %v1802_v13 = vadd.f32 %v1801_v18, %v1800_v23  ;;  %v1824_v16 = vadd.f32 %v1823_v57, %v1822_v35  ;;  %v1803_v14 = vpop.f32.mrb[2].mxu0  ;;  %v1825_v17 = vpop.f32.mrb[2].mxu1 }
 0x1de   : > { %v1804_v22 = vpop.f32.mrb[3].mxu0  ;;  %v1826_v7 = vpop.f32.mrb[3].mxu1 }
 0x1df   : > { %v1476_v31 = vadd.f32 %v1824_v16, %v1802_v13  ;;  %v1805_v36 = vadd.f32 %v1804_v22, %v1803_v14  ;;  %v1827_v37 = vadd.f32 %v1826_v7, %v1825_v17 }
 0x1e1   : > { %v1479_v44 = vadd.f32 %v1827_v37, %v1805_v36 }
 0x1fb   : > { %v1844_v6 = vpop.f32.mrb[4].mxu0  ;;  %v1866_v30 = vpop.f32.mrb[4].mxu1 }
 0x1fc   : > { %v1845_v52 = vpop.f32.mrb[5].mxu0  ;;  %v1867_v45 = vpop.f32.mrb[5].mxu1 }
 0x1fd   : > { %v1846_v38 = vadd.f32 %v1845_v52, %v1844_v6  ;;  %v1868_v3 = vadd.f32 %v1867_v45, %v1866_v30  ;;  %v1847_v43 = vpop.f32.mrb[6].mxu0  ;;  %v1869_v39 = vpop.f32.mrb[6].mxu1 }
 0x1fe   : > { %v1848_v9 = vpop.f32.mrb[7].mxu0  ;;  %v1870_v60 = vpop.f32.mrb[7].mxu1 }
 0x1ff   : > { %v1517_v25 = vadd.f32 %v1846_v38, %v1476_v31  ;;  %v1849_v48 = vadd.f32 %v1848_v9, %v1847_v43  ;;  %v1871_v27 = vadd.f32 %v1870_v60, %v1869_v39 }
 0x201   : > { %v1558_v46 = vadd.f32 %v1868_v3, %v1517_v25  ;;  %v1520_v54 = vadd.f32 %v1849_v48, %v1479_v44  ;;  %1571 = sbr.rel (%p1777_p13) target bundleno = 528 (0x210), region = 48 }
 0x203   : > { %v1564_v58 = vadd.f32 %v1558_v46, %v886_v53  ;;  %v1561_v32 = vadd.f32 %v1871_v27, %v1520_v54 }
 0x205   : > { %1566 = vst [vmem:[#allocation2] sm:$0xff] %v1564_v58  ;;  %v1565_v47 = vadd.f32 %v1561_v32, %v887_v33 }
 0x207   : > { %1567 = vst [vmem:[#allocation2 + $0x8] sm:$0xff] %v1565_v47 }
 0x20c   : > { %v1572_v0 = vld [vmem:[#allocation2] sm:$0xff] }
 0x20d   : > { %1574 = vst [vmem:[#allocation8] sm:$0xff] %v1572_v0 }
 0x20e   : > { %v1573_v19 = vld [vmem:[#allocation2 + $0x8] sm:$0xff] }
 0x20f   : > { %1575 = vst [vmem:[#allocation8 + $0x8] sm:$0xff] %v1573_v19 }
 0x210 PF: > { %p2868_p6 = scmp.eq.s32.totalorder %s1687_s18, 3  ;;  %s2184_s26 = smov [#allocation8]  }
 0x211   : > { %s1585_s27 = sshll.u32 %s2184_s26, 4  ;;  %s1586_s27 = int_to_ptr.vmem [resolvable:$true] %s1585_s27 }
 0x212   : > { %s2086_s29 = scalar_lea.vmem %s1586_s27, 256  ;;  %p2093_p1 = scmp.lt.s32.totalorder %s1586_s27, %s1586_s27 }
 0x213   : > { %p2087_p8 = scmp.ne.s32.totalorder %s1586_s27, %s2086_s29  ;;  %p2094_p5 = scmp.lt.s32.totalorder %s2086_s29, %s2086_s29 }
 0x215   : > { %p2088_p3 = pnand %p2087_p8, %p2868_p6  ;;  %p2095_p10 = por %p2094_p5, %p2093_p1 }
 0x217   : > { %p2089_p4 = pneg %p2088_p3 }
 0x219   : > { %p2096_p11 = pnand %p2095_p10, %p2089_p4 }
 0x21b   : > { %2099 = shalt.err (!%p2096_p11)
}
 0x21c   : > { %s2100_s18 = scalar_lea.hbm %s2915_s3, 256 }
 0x21d   : > { %p2101_p12 = scmp.ne.s32.totalorder %s2915_s3, %s2100_s18  ;;  %p2106_p7 = scmp.lt.u32.totalorder %s2100_s18, %s2915_s3 }
 0x21f   : > { %p2102_p0 = pnand %p2101_p12, %p2868_p6 }
 0x221   : > { %p2103_p2 = pneg %p2102_p0 }
 0x223   : > { %p2108_p9 = pnand %p2106_p7, %p2103_p2 }
 0x225   : > { %2111 = shalt.err (!%p2108_p9)
}
 0x226   : > { %s2185_s7 = smov 128   ;;  %s2186_s20 = smov 8  }
 0x227   : > { %1877 = dma.vmem_to_hbm [thread:$0]  (%p2868_p6), %s1586_s27, 256, %s2915_s3, [#allocation5], %s2185_s7, %s2185_s7, %s2186_s20  }
 0x228   : > { %2145 = dma.done.wait (%p2868_p6), [#allocation5], 256  }
 0x229   : > { %2147 = vsyncadd (%p2868_p6), [#allocation5], 4294967040 }
 0x22a PF: > { %s20_s17 = sadd.s32 1, %s2170_s17   ;;  %s2987_s12 = smov %s2154_s13 }
 0x22b   : > { %p17_p13 = scmp.ge.s32.totalorder %s20_s17, 6   ;;  %s2988_s13 = smov %s2158_s14 }
 0x22c   : > { %s2989_s14 = smov %s2258_s24  ;;  %s2990_s15 = smov %s2166_s16 }
 0x22d   : > { %s2991_s16 = smov %s2993_s19  ;;  %19 = sbr.rel (!%p17_p13) target bundleno = 7 (0x7), region = 100 }
 0x234   :  { %1601 = vsyncpa [#allocation4], 1 }
 0x235   :  { %1603 = vsyncpa [#allocation4 + $0x1], 1 }
 0x236   :  { %1604 = vsyncpa [#allocation7], 1 }
 0x237   :  { %1606 = vsyncpa [#allocation7 + $0x1], 1 }
 0x238   :  { %1607 = vsyncpa [#allocation5], 1 }
 0x239   :  { %1609 = vsyncpa [#allocation5 + $0x1], 1 }

</bundles_post_ra>
